<compile_context>
chip_gen: v5e
topology: v5e:2x2
jax: 0.10.0
libtpu: 0.0.40
codegen_flags: <defaults>
</compile_context>

<pallas_src>
import numpy as np
import jax
import jax.numpy as jnp
from jax.experimental import pallas as pl
from jax.experimental.pallas import tpu as pltpu


def _round_up(x, m):
    return (x + m - 1) // m * m


# ----------------------------- Pallas kernels -------------------------------

def _conv_stats_kernel(g_ref, w_ref, o_ref, sum_ref, sq_ref):
    # grid = (Npad // TILE_N,).  Weight block is VMEM-resident (constant index_map).
    # sum/sq are resident (1, Cpad) accumulators -> grid axis must be "arbitrary".
    @pl.when(pl.program_id(0) == 0)
    def _():
        sum_ref[...] = jnp.zeros_like(sum_ref)
        sq_ref[...] = jnp.zeros_like(sq_ref)

    acc = jnp.dot(g_ref[...], w_ref[...], preferred_element_type=jnp.float32)
    o_ref[...] = acc
    sum_ref[...] += jnp.sum(acc, axis=0, keepdims=True)
    sq_ref[...] += jnp.sum(acc * acc, axis=0, keepdims=True)


def _bn_relu_kernel(x_ref, scale_ref, shift_ref, o_ref):
    o_ref[...] = jnp.maximum(x_ref[...] * scale_ref[...] + shift_ref[...], 0.0)


# ------------------------------ wrappers -------------------------------------

def sparse_conv3d_bnstats_pallas(gathered, weight, *, tile_n=256):
    """gathered: [Npad, KCpad] bf16, weight: [KCpad, Cpad] bf16.

    Returns (conv [Npad, Cpad] f32, per-channel sum [1, Cpad], sum_sq [1, Cpad]).
    VMEM use is tiny (tens of KiB per buffer at tile_n=256, KCpad=Cpad=128) so it is
    safely within the default scoped VMEM budget on v5e/v6e/v7x.
    """
    Npad, KCpad = gathered.shape
    Cpad = weight.shape[-1]
    assert Npad % tile_n == 0
    return pl.pallas_call(
        _conv_stats_kernel,
        out_shape=(jax.ShapeDtypeStruct((Npad, Cpad), jnp.float32),
                   jax.ShapeDtypeStruct((1, Cpad), jnp.float32),
                   jax.ShapeDtypeStruct((1, Cpad), jnp.float32)),
        grid=(Npad // tile_n,),
        in_specs=[
            pl.BlockSpec((tile_n, KCpad), lambda n: (n, 0)),
            pl.BlockSpec((KCpad, Cpad), lambda n: (0, 0)),    # resident weight
        ],
        out_specs=(pl.BlockSpec((tile_n, Cpad), lambda n: (n, 0)),
                   pl.BlockSpec((1, Cpad), lambda n: (0, 0)),  # resident accumulator
                   pl.BlockSpec((1, Cpad), lambda n: (0, 0))), # resident accumulator
        compiler_params=pltpu.CompilerParams(
            # "arbitrary": stats outputs are revisited/accumulated across the grid.
            dimension_semantics=("arbitrary",)),
    )(gathered, weight)


def bn_relu_pallas(x, scale, shift, *, tile_n=256):
    """x: [Npad, Cpad] f32; scale/shift: [1, Cpad] f32."""
    Npad, Cpad = x.shape
    assert Npad % tile_n == 0
    return pl.pallas_call(
        _bn_relu_kernel,
        out_shape=jax.ShapeDtypeStruct((Npad, Cpad), jnp.float32),
        grid=(Npad // tile_n,),
        in_specs=[
            pl.BlockSpec((tile_n, Cpad), lambda n: (n, 0)),
            pl.BlockSpec((1, Cpad), lambda n: (0, 0)),
            pl.BlockSpec((1, Cpad), lambda n: (0, 0)),
        ],
        out_specs=pl.BlockSpec((tile_n, Cpad), lambda n: (n, 0)),
        compiler_params=pltpu.CompilerParams(
            dimension_semantics=("parallel",)),   # shards across v7x's 2 TCs
    )(x, scale, shift)


# --------------------------- glue: kernel map --------------------------------

def build_gathered_flat(feats, coords, spatial, batch, ks=3, dilation=1):
    """Gather neighbor features into [N, K*Cin] (zero where no neighbor exists).

    feats:  [N, Cin]  (jnp)
    coords: [N, 4]    (np int32, columns = batch, x, y, z)
    """
    # TODO(synk): for very large point clouds the materialized K*Cin gather should be
    # replaced by a scalar-prefetched neighbor-index table + in-kernel DMA gather.
    N, Cin = feats.shape
    lut = -np.ones((batch, spatial, spatial, spatial), dtype=np.int32)
    lut[coords[:, 0], coords[:, 1], coords[:, 2], coords[:, 3]] = np.arange(N, dtype=np.int32)

    r = ks // 2
    offsets = [(dx, dy, dz)
               for dx in range(-r, r + 1)
               for dy in range(-r, r + 1)
               for dz in range(-r, r + 1)]

    idx_cols = []
    for (dx, dy, dz) in offsets:
        nb = coords.copy()
        nb[:, 1] += dx * dilation
        nb[:, 2] += dy * dilation
        nb[:, 3] += dz * dilation
        in_bounds = ((nb[:, 1] >= 0) & (nb[:, 1] < spatial) &
                     (nb[:, 2] >= 0) & (nb[:, 2] < spatial) &
                     (nb[:, 3] >= 0) & (nb[:, 3] < spatial))
        nb_c = np.clip(nb, 0, spatial - 1)
        idx = lut[nb[:, 0], nb_c[:, 1], nb_c[:, 2], nb_c[:, 3]]
        idx_cols.append(np.where(in_bounds & (idx >= 0), idx, N).astype(np.int32))
    idx_all = np.stack(idx_cols, axis=1)                                   # [N, K]

    feats_pad = jnp.concatenate([feats, jnp.zeros((1, Cin), feats.dtype)], axis=0)
    gathered = jnp.take(feats_pad, jnp.asarray(idx_all), axis=0)           # [N, K, Cin]
    return gathered.reshape(N, -1)                                         # [N, K*Cin]


def basic_convolution_block(feats, coords, weight, gamma, beta,
                            *, spatial, batch, ks=3, dilation=1, eps=1e-5, tile_n=256):
    # TODO(synk): stride > 1 (coordinate downsampling) not implemented; module default stride=1.
    N, Cin = feats.shape
    K = ks ** 3
    Cout = weight.shape[-1]

    gathered = build_gathered_flat(feats, coords, spatial, batch, ks=ks, dilation=dilation)

    # Pad N to tile_n and channels to 128-lane multiples; padded rows/cols are exact
    # zeros, so they are inert for the conv and contribute nothing to BN statistics.
    Npad = _round_up(N, tile_n)
    KCpad = _round_up(K * Cin, 128)
    Cpad = _round_up(Cout, 128)

    g = jnp.zeros((Npad, KCpad), jnp.bfloat16).at[:N, :K * Cin].set(
        gathered.astype(jnp.bfloat16))
    w = jnp.zeros((KCpad, Cpad), jnp.bfloat16).at[:K * Cin, :Cout].set(
        weight.reshape(K * Cin, Cout).astype(jnp.bfloat16))

    conv, s, sq = sparse_conv3d_bnstats_pallas(g, w, tile_n=tile_n)        # fused stats

    n = jnp.float32(N)                            # true N (padded rows contribute 0)
    mean = s / n
    var = sq / n - mean * mean                    # biased (PyTorch training-mode BN)
    gamma_p = jnp.zeros((1, Cpad), jnp.float32).at[0, :Cout].set(gamma)
    beta_p = jnp.zeros((1, Cpad), jnp.float32).at[0, :Cout].set(beta)
    scale = gamma_p * jax.lax.rsqrt(var + eps)
    shift = beta_p - mean * scale

    out = bn_relu_pallas(conv, scale, shift, tile_n=tile_n)                # [Npad, Cpad]
    return out[:N, :Cout]


# --------------------------------- main ---------------------------------------

if __name__ == "__main__":
    B, D = 2, 8          # batch size, spatial extent of the voxel grid
    N = 64               # number of active (sparse) points
    Cin, Cout, KS = 4, 8, 3
    K = KS ** 3

    key = jax.random.PRNGKey(0)
    k_coord, k_feat, k_w = jax.random.split(key, 3)

    # deterministic distinct active voxel coordinates
    lin = np.asarray(jax.random.choice(k_coord, B * D * D * D, shape=(N,), replace=False))
    b = lin // (D * D * D)
    rem = lin % (D * D * D)
    coords = np.stack([b, rem // (D * D), (rem // D) % D, rem % D], axis=1).astype(np.int32)

    feats = jax.random.normal(k_feat, (N, Cin), dtype=jnp.float32)
    weight = jax.random.normal(k_w, (K, Cin, Cout), dtype=jnp.float32) * np.sqrt(2.0 / (K * Cin))
    gamma = jnp.ones((Cout,), dtype=jnp.float32)   # PyTorch BatchNorm default init
    beta = jnp.zeros((Cout,), dtype=jnp.float32)

    out = basic_convolution_block(feats, coords, weight, gamma, beta,
                                  spatial=D, batch=B, ks=KS, dilation=1)
    out = jax.block_until_ready(out)

    # pure-JAX reference (same bf16-rounded operands, f32 math) for correctness
    gathered_ref = build_gathered_flat(feats, coords, D, B, ks=KS, dilation=1)
    g_ref = gathered_ref.astype(jnp.bfloat16).astype(jnp.float32)
    w_ref = weight.reshape(K * Cin, Cout).astype(jnp.bfloat16).astype(jnp.float32)
    conv_ref = g_ref @ w_ref
    mean_ref = conv_ref.mean(axis=0, keepdims=True)
    var_ref = conv_ref.var(axis=0, keepdims=True)
    ref = jnp.maximum((conv_ref - mean_ref) / jnp.sqrt(var_ref + 1e-5) * gamma + beta, 0.0)
    np.testing.assert_allclose(np.asarray(out), np.asarray(ref), rtol=2e-3, atol=2e-3)

    print("KERNEL_OK")
</pallas_src>

<mosaic_0001>
module attributes {stable_mosaic.version = 11 : i64} {
  func.func @_conv_stats_kernel(%arg0: i32, %arg1: memref<256x128xbf16, #tpu.memory_space<vmem>>, %arg2: memref<128x128xbf16, #tpu.memory_space<vmem>>, %arg3: memref<256x128xf32, #tpu.memory_space<vmem>>, %arg4: memref<1x128xf32, #tpu.memory_space<vmem>>, %arg5: memref<1x128xf32, #tpu.memory_space<vmem>>) attributes {dimension_semantics = [#tpu.dimension_semantics<arbitrary>], iteration_bounds = array<i64: 1>, scalar_prefetch = 0 : i64, scratch_operands = 0 : i64, tpu.core_type = #tpu.core_type<tc>, window_params = [{transform_indices = @transform_0, window_bounds = array<i64: 256, 128>}, {pipeline_mode = #tpu.pipeline_mode<synchronous>, transform_indices = @transform_1, window_bounds = array<i64: 128, 128>}, {transform_indices = @transform_2, window_bounds = array<i64: 256, 128>}, {pipeline_mode = #tpu.pipeline_mode<synchronous>, transform_indices = @transform_3, window_bounds = array<i64: 1, 128>}, {pipeline_mode = #tpu.pipeline_mode<synchronous>, transform_indices = @transform_4, window_bounds = array<i64: 1, 128>}]} {
    %c0_i32 = arith.constant 0 : i32
    %0 = arith.cmpi eq, %arg0, %c0_i32 : i32
    %1 = arith.extui %0 : i1 to i32
    %c0_i32_0 = arith.constant 0 : i32
    %2 = arith.cmpi ne, %1, %c0_i32_0 : i32
    scf.if %2 {
      %cst_16 = arith.constant 0.000000e+00 : f32
      %18 = vector.broadcast %cst_16 : f32 to vector<1x128xf32>
      %c0_17 = arith.constant 0 : index
      %c0_18 = arith.constant 0 : index
      %19 = vector.load %arg4[%c0_17, %c0_18] : memref<1x128xf32, #tpu.memory_space<vmem>>, vector<1x128xf32>
      tpu.vector_store %arg4[%c0_17, %c0_18], %18 {strides = array<i32>} : memref<1x128xf32, #tpu.memory_space<vmem>>, vector<1x128xf32>,
      %cst_19 = arith.constant 0.000000e+00 : f32
      %20 = vector.broadcast %cst_19 : f32 to vector<1x128xf32>
      %c0_20 = arith.constant 0 : index
      %c0_21 = arith.constant 0 : index
      %21 = vector.load %arg5[%c0_20, %c0_21] : memref<1x128xf32, #tpu.memory_space<vmem>>, vector<1x128xf32>
      tpu.vector_store %arg5[%c0_20, %c0_21], %20 {strides = array<i32>} : memref<1x128xf32, #tpu.memory_space<vmem>>, vector<1x128xf32>,
    } else {
    }
    %c0 = arith.constant 0 : index
    %c0_1 = arith.constant 0 : index
    %3 = vector.load %arg1[%c0, %c0_1] : memref<256x128xbf16, #tpu.memory_space<vmem>>, vector<256x128xbf16>
    %c0_2 = arith.constant 0 : index
    %c0_3 = arith.constant 0 : index
    %4 = vector.load %arg2[%c0_2, %c0_3] : memref<128x128xbf16, #tpu.memory_space<vmem>>, vector<128x128xbf16>
    %cst = arith.constant dense<0.000000e+00> : vector<256x128xf32>
    %5 = tpu.matmul %3, %4, %cst {dimension_numbers = #tpu.dot_dimension_numbers<[1], [0], [0], [1], [0, 0, 1, 1], [], []>} : vector<256x128xbf16>, vector<128x128xbf16>, vector<256x128xf32> -> vector<256x128xf32>
    %c0_4 = arith.constant 0 : index
    %c0_5 = arith.constant 0 : index
    %6 = vector.load %arg3[%c0_4, %c0_5] : memref<256x128xf32, #tpu.memory_space<vmem>>, vector<256x128xf32>
    tpu.vector_store %arg3[%c0_4, %c0_5], %5 {strides = array<i32>} : memref<256x128xf32, #tpu.memory_space<vmem>>, vector<256x128xf32>,
    %c0_6 = arith.constant 0 : index
    %c0_7 = arith.constant 0 : index
    %7 = vector.load %arg4[%c0_6, %c0_7] : memref<1x128xf32, #tpu.memory_space<vmem>>, vector<1x128xf32>
    %cst_8 = arith.constant dense<0.000000e+00> : vector<128xf32>
    %8 = vector.multi_reduction <add>, %5, %cst_8 [0] : vector<256x128xf32> to vector<128xf32>
    %9 = vector.shape_cast %8 : vector<128xf32> to vector<1x128xf32>
    %10 = arith.addf %7, %9 : vector<1x128xf32>
    %c0_9 = arith.constant 0 : index
    %c0_10 = arith.constant 0 : index
    %11 = vector.load %arg4[%c0_9, %c0_10] : memref<1x128xf32, #tpu.memory_space<vmem>>, vector<1x128xf32>
    tpu.vector_store %arg4[%c0_9, %c0_10], %10 {strides = array<i32>} : memref<1x128xf32, #tpu.memory_space<vmem>>, vector<1x128xf32>,
    %c0_11 = arith.constant 0 : index
    %c0_12 = arith.constant 0 : index
    %12 = vector.load %arg5[%c0_11, %c0_12] : memref<1x128xf32, #tpu.memory_space<vmem>>, vector<1x128xf32>
    %13 = arith.mulf %5, %5 : vector<256x128xf32>
    %cst_13 = arith.constant dense<0.000000e+00> : vector<128xf32>
    %14 = vector.multi_reduction <add>, %13, %cst_13 [0] : vector<256x128xf32> to vector<128xf32>
    %15 = vector.shape_cast %14 : vector<128xf32> to vector<1x128xf32>
    %16 = arith.addf %12, %15 : vector<1x128xf32>
    %c0_14 = arith.constant 0 : index
    %c0_15 = arith.constant 0 : index
    %17 = vector.load %arg5[%c0_14, %c0_15] : memref<1x128xf32, #tpu.memory_space<vmem>>, vector<1x128xf32>
    tpu.vector_store %arg5[%c0_14, %c0_15], %16 {strides = array<i32>} : memref<1x128xf32, #tpu.memory_space<vmem>>, vector<1x128xf32>,
    return
  }
  func.func @transform_0(%arg0: i32) -> (i32, i32) {
    %c0_i32 = arith.constant 0 : i32
    %c0_i32_0 = arith.constant 0 : i32
    return %arg0, %c0_i32 : i32, i32
  }
  func.func @transform_1(%arg0: i32) -> (i32, i32) {
    %c0_i32 = arith.constant 0 : i32
    %c0_i32_0 = arith.constant 0 : i32
    %c0_i32_1 = arith.constant 0 : i32
    return %c0_i32, %c0_i32_0 : i32, i32
  }
  func.func @transform_2(%arg0: i32) -> (i32, i32) {
    %c0_i32 = arith.constant 0 : i32
    %c0_i32_0 = arith.constant 0 : i32
    return %arg0, %c0_i32 : i32, i32
  }
  func.func @transform_3(%arg0: i32) -> (i32, i32) {
    %c0_i32 = arith.constant 0 : i32
    %c0_i32_0 = arith.constant 0 : i32
    %c0_i32_1 = arith.constant 0 : i32
    return %c0_i32, %c0_i32_0 : i32, i32
  }
  func.func @transform_4(%arg0: i32) -> (i32, i32) {
    %c0_i32 = arith.constant 0 : i32
    %c0_i32_0 = arith.constant 0 : i32
    %c0_i32_1 = arith.constant 0 : i32
    return %c0_i32, %c0_i32_0 : i32, i32
  }
}

</mosaic_0001>

<bundles_post_ra>
// kernel: tpu_custom_call.1
= control target key start
LH: loop header
LB: loop body
LE: loop exit
PB: predicated region body
PF: predicated region fallthrough
CT: control target
= control target key end

     0   :  { %10 = vsyncpa [#allocation3], 0  ;;  %s988_s0 = inlined_call_operand.hbm [shape: bf16[256,128], index: 0, kind: input, shape index: {}]   ;;  %s989_s1 = inlined_call_operand.hbm [shape: bf16[128,128], index: 1, kind: input, shape index: {}]   ;;  %s990_s2 = inlined_call_operand.hbm [shape: f32[256,128], index: 2, kind: output, shape index: {0}]   ;;  %s991_s3 = inlined_call_operand.hbm [shape: f32[1,128], index: 3, kind: output, shape index: {1}]   ;;  %s992_s4 = inlined_call_operand.hbm [shape: f32[1,128], index: 4, kind: output, shape index: {2}]  }
   0x1   :  { %11 = vsyncpa [#allocation6], 0 }
   0x2   :  { %12 = vsyncpa [#allocation4], 0 }
   0x3   :  { %13 = vsyncpa [#allocation9], 0  ;;  %s18_s17 = sshll.u32 %s988_s0, 4  ;;  %s812_s18 = smov [#allocation2]   ;;  %s19_s17 = int_to_ptr.hbm [resolvable:$true] %s18_s17 }
   0x4   :  { %s20_s19 = sshll.u32 %s812_s18, 4  ;;  %s31_s22 = sshll.u32 %s989_s1, 4  ;;  %s21_s19 = int_to_ptr.vmem [resolvable:$true] %s20_s19  ;;  %s32_s22 = int_to_ptr.hbm [resolvable:$true] %s31_s22 }
   0x5   :  { %s813_s23 = smov 64   ;;  %s814_s24 = smov 4  }
   0x6   :  { %26 = dma.hbm_to_vmem [thread:$0]  %s19_s17, 2048, %s21_s19, [#allocation3], %s813_s23, %s813_s23, %s814_s24  }
   0x7   :  { %s815_s25 = smov [#allocation5]  }
   0x8   :  { %s33_s26 = sshll.u32 %s815_s25, 4  ;;  %s34_s26 = int_to_ptr.vmem [resolvable:$true] %s33_s26 }
   0x9   :  { %39 = dma.hbm_to_vmem [thread:$0]  %s32_s22, 1024, %s34_s26, [#allocation6], %s813_s23, %s813_s23, %s814_s24  }
   0xa   :  { %804 = dma.done.wait [#allocation3], 2048  }
   0xb   :  { %805 = vsyncadd [#allocation3], 4294965248 }
   0xc   :  { %806 = dma.done.wait [#allocation6], 1024  }
   0xd   :  { %807 = vsyncadd [#allocation6], 4294966272  ;;  %v649_v0 = vld [vmem:[#allocation5 + $0x38] sm:$0xff]  ;;  %v648_v1 = vld [vmem:[#allocation5 + $0x30] sm:$0xff]  ;;  %s816_s0 = smov [#allocation7]   ;;  %s485_s29 = sshll.u32 %s990_s2, 4  ;;  %s486_s29 = int_to_ptr.hbm [resolvable:$true] %s485_s29 }
   0xe   :  { %246 = vmatpush.bf16.msra.mxu0 %v649_v0  ;;  %650 = vmatpush.bf16.msra.mxu1 %v649_v0  ;;  %v647_v2 = vld [vmem:[#allocation5 + $0x28] sm:$0xff]  ;;  %v646_v3 = vld [vmem:[#allocation5 + $0x20] sm:$0xff]  ;;  %v645_v4 = vld [vmem:[#allocation5 + $0x18] sm:$0xff]  ;;  %s483_s1 = sshll.u32 %s816_s0, 4  ;;  %s817_s2 = smov 128   ;;  %s484_s1 = int_to_ptr.vmem [resolvable:$true] %s483_s1 }
   0xf   :  { %651 = vmatpush.bf16.msra.mxu2 %v649_v0  ;;  %652 = vmatpush.bf16.msra.mxu3 %v649_v0  ;;  %v644_v5 = vld [vmem:[#allocation5 + $0x10] sm:$0xff]  ;;  %v643_v6 = vld [vmem:[#allocation5 + $0x8] sm:$0xff]  ;;  %v642_v7 = vld [vmem:[#allocation5] sm:$0xff]  ;;  %s818_s30 = smov 8   ;;  %s820_s5 = smov [#allocation8]  }
  0x10   :  { %v626_v8 = vld [vmem:[#allocation2] sm:$0xff]  ;;  %v627_v12 = vld [vmem:[#allocation2 + $0x8] sm:$0xff]  ;;  %v628_v16 = vld [vmem:[#allocation2 + $0x10] sm:$0xff]  ;;  %s497_s6 = sshll.u32 %s820_s5, 4  ;;  %s499_s9 = sshll.u32 %s991_s3, 4  ;;  %s498_s6 = int_to_ptr.vmem [resolvable:$true] %s497_s6  ;;  %s500_s9 = int_to_ptr.hbm [resolvable:$true] %s499_s9 }
  0x11   :  { %v630_v9 = vld [vmem:[#allocation2 + $0x20] sm:$0xff]  ;;  %v631_v13 = vld [vmem:[#allocation2 + $0x28] sm:$0xff]  ;;  %v632_v17 = vld [vmem:[#allocation2 + $0x30] sm:$0xff]  ;;  %s821_s10 = smov [#allocation10]   ;;  %s510_s14 = sshll.u32 %s992_s4, 4  ;;  %s511_s14 = int_to_ptr.hbm [resolvable:$true] %s510_s14 }
  0x12   :  { %247 = vmatpush.bf16.msra.mxu0 %v648_v1  ;;  %653 = vmatpush.bf16.msra.mxu1 %v648_v1  ;;  %v634_v10 = vld [vmem:[#allocation2 + $0x40] sm:$0xff]  ;;  %v635_v14 = vld [vmem:[#allocation2 + $0x48] sm:$0xff]  ;;  %v636_v18 = vld [vmem:[#allocation2 + $0x50] sm:$0xff]  ;;  %s508_s11 = sshll.u32 %s821_s10, 4  ;;  %s509_s11 = int_to_ptr.vmem [resolvable:$true] %s508_s11 }
  0x13   :  { %654 = vmatpush.bf16.msra.mxu2 %v648_v1  ;;  %655 = vmatpush.bf16.msra.mxu3 %v648_v1  ;;  %v638_v11 = vld [vmem:[#allocation2 + $0x60] sm:$0xff]  ;;  %v639_v15 = vld [vmem:[#allocation2 + $0x68] sm:$0xff]  ;;  %v640_v19 = vld [vmem:[#allocation2 + $0x70] sm:$0xff] }
  0x14   :  { %v629_v20 = vld [vmem:[#allocation2 + $0x18] sm:$0xff] }
  0x15   :  { %v633_v21 = vld [vmem:[#allocation2 + $0x38] sm:$0xff] }
  0x16   :  { %248 = vmatpush.bf16.msra.mxu0 %v647_v2  ;;  %656 = vmatpush.bf16.msra.mxu1 %v647_v2  ;;  %v637_v22 = vld [vmem:[#allocation2 + $0x58] sm:$0xff] }
  0x17   :  { %657 = vmatpush.bf16.msra.mxu2 %v647_v2  ;;  %658 = vmatpush.bf16.msra.mxu3 %v647_v2  ;;  %v641_v23 = vld [vmem:[#allocation2 + $0x78] sm:$0xff] }
  0x1a   :  { %249 = vmatpush.bf16.msra.mxu0 %v646_v3  ;;  %659 = vmatpush.bf16.msra.mxu1 %v646_v3 }
  0x1b   :  { %660 = vmatpush.bf16.msra.mxu2 %v646_v3  ;;  %661 = vmatpush.bf16.msra.mxu3 %v646_v3 }
  0x1e   :  { %250 = vmatpush.bf16.msra.mxu0 %v645_v4  ;;  %662 = vmatpush.bf16.msra.mxu1 %v645_v4 }
  0x1f   :  { %663 = vmatpush.bf16.msra.mxu2 %v645_v4  ;;  %664 = vmatpush.bf16.msra.mxu3 %v645_v4 }
  0x22   :  { %251 = vmatpush.bf16.msra.mxu0 %v644_v5  ;;  %665 = vmatpush.bf16.msra.mxu1 %v644_v5 }
  0x23   :  { %666 = vmatpush.bf16.msra.mxu2 %v644_v5  ;;  %667 = vmatpush.bf16.msra.mxu3 %v644_v5 }
  0x26   :  { %252 = vmatpush.bf16.msra.mxu0 %v643_v6  ;;  %668 = vmatpush.bf16.msra.mxu1 %v643_v6 }
  0x27   :  { %669 = vmatpush.bf16.msra.mxu2 %v643_v6  ;;  %670 = vmatpush.bf16.msra.mxu3 %v643_v6 }
  0x2a   :  { %253 = vmatpush.bf16.msra.mxu0 %v642_v7  ;;  %671 = vmatpush.bf16.msra.mxu1 %v642_v7 }
  0x2b   :  { %672 = vmatpush.bf16.msra.mxu2 %v642_v7  ;;  %673 = vmatpush.bf16.msra.mxu3 %v642_v7 }
  0x2d   :  { %254 = vmatmul.bf16.vlgmr.msra.gmra.mxu0 %v626_v8  ;;  %274 = vmatmul.bf16.vlgmr.msra.gmra.mxu1 %v630_v9 }
  0x2e   :  { %294 = vmatmul.bf16.vlgmr.msra.gmra.mxu2 %v634_v10  ;;  %314 = vmatmul.bf16.vlgmr.msra.gmra.mxu3 %v638_v11 }
  0x3d   :  { %259 = vmatmul.bf16.gmra.mxu0 %v627_v12  ;;  %279 = vmatmul.bf16.gmra.mxu1 %v631_v13 }
  0x3e   :  { %299 = vmatmul.bf16.gmra.mxu2 %v635_v14  ;;  %319 = vmatmul.bf16.gmra.mxu3 %v639_v15 }
  0x4d   :  { %264 = vmatmul.bf16.gmra.mxu0 %v628_v16  ;;  %284 = vmatmul.bf16.gmra.mxu1 %v632_v17 }
  0x4e   :  { %304 = vmatmul.bf16.gmra.mxu2 %v636_v18  ;;  %324 = vmatmul.bf16.gmra.mxu3 %v640_v19 }
  0x5d   :  { %269 = vmatmul.bf16.gmra.mxu0 %v629_v20  ;;  %289 = vmatmul.bf16.gmra.mxu1 %v633_v21 }
  0x5e   :  { %309 = vmatmul.bf16.gmra.mxu2 %v637_v22  ;;  %329 = vmatmul.bf16.gmra.mxu3 %v641_v23 }
  0xaa   :  { %v255_v24 = vpop.f32.mrf.mxu0  ;;  %v853_v25 = vpop.f32.mrf.mxu1 }
  0xab   :  { %335 = vst [vmem:[#allocation7] sm:$0xff] %v255_v24  ;;  %v408_v47 = vmul.f32 %v255_v24, %v255_v24  ;;  %v416_v11 = vmul.f32 %v853_v25, %v853_v25 }
  0xac   :  { %343 = vst [vmem:[#allocation7 + $0x40] sm:$0xff] %v853_v25 }
  0xb1   :  { %v856_v26 = vpop.f32.mrf.mxu2  ;;  %v861_v29 = vpop.f32.mrf.mxu3 }
  0xb2   :  { %v257_v27 = vpop.f32.mrf.mxu0  ;;  %v858_v28 = vpop.f32.mrf.mxu1  ;;  %351 = vst [vmem:[#allocation7 + $0x80] sm:$0xff] %v856_v26 }
  0xb3   :  { %336 = vst [vmem:[#allocation7 + $0x8] sm:$0xff] %v257_v27  ;;  %v409_v46 = vmul.f32 %v257_v27, %v257_v27  ;;  %v368_v48 = vadd.f32 %v257_v27, %v255_v24  ;;  %v417_v14 = vmul.f32 %v858_v28, %v858_v28 }
  0xb4   :  { %344 = vst [vmem:[#allocation7 + $0x48] sm:$0xff] %v858_v28 }
  0xb5   :  { %359 = vst [vmem:[#allocation7 + $0xc0] sm:$0xff] %v861_v29  ;;  %v440_v50 = vadd.f32 %v409_v46, %v408_v47 }
  0xb9   :  { %v865_v30 = vpop.f32.mrf.mxu2  ;;  %v870_v33 = vpop.f32.mrf.mxu3 }
  0xba   :  { %v260_v31 = vpop.f32.mrf.mxu0  ;;  %v867_v32 = vpop.f32.mrf.mxu1  ;;  %352 = vst [vmem:[#allocation7 + $0x88] sm:$0xff] %v865_v30 }
  0xbb   :  { %337 = vst [vmem:[#allocation7 + $0x10] sm:$0xff] %v260_v31  ;;  %v410_v49 = vmul.f32 %v260_v31, %v260_v31  ;;  %v369_v51 = vadd.f32 %v368_v48, %v260_v31  ;;  %v418_v17 = vmul.f32 %v867_v32, %v867_v32 }
  0xbc   :  { %345 = vst [vmem:[#allocation7 + $0x50] sm:$0xff] %v867_v32 }
  0xbd   :  { %360 = vst [vmem:[#allocation7 + $0xc8] sm:$0xff] %v870_v33  ;;  %v441_v56 = vadd.f32 %v440_v50, %v410_v49  ;;  %v424_v49 = vmul.f32 %v856_v26, %v856_v26 }
  0xc1   :  { %v874_v34 = vpop.f32.mrf.mxu2  ;;  %v879_v37 = vpop.f32.mrf.mxu3 }
  0xc2   :  { %v262_v35 = vpop.f32.mrf.mxu0  ;;  %v876_v36 = vpop.f32.mrf.mxu1  ;;  %353 = vst [vmem:[#allocation7 + $0x90] sm:$0xff] %v874_v34 }
  0xc3   :  { %338 = vst [vmem:[#allocation7 + $0x18] sm:$0xff] %v262_v35  ;;  %v411_v52 = vmul.f32 %v262_v35, %v262_v35  ;;  %v370_v57 = vadd.f32 %v369_v51, %v262_v35  ;;  %v419_v21 = vmul.f32 %v876_v36, %v876_v36  ;;  %v425_v51 = vmul.f32 %v865_v30, %v865_v30 }
  0xc4   :  { %346 = vst [vmem:[#allocation7 + $0x58] sm:$0xff] %v876_v36 }
  0xc5   :  { %361 = vst [vmem:[#allocation7 + $0xd0] sm:$0xff] %v879_v37  ;;  %v442_v60 = vadd.f32 %v441_v56, %v411_v52 }
  0xc9   :  { %v883_v38 = vpop.f32.mrf.mxu2  ;;  %v888_v41 = vpop.f32.mrf.mxu3 }
  0xca   :  { %v265_v39 = vpop.f32.mrf.mxu0  ;;  %v885_v40 = vpop.f32.mrf.mxu1  ;;  %354 = vst [vmem:[#allocation7 + $0x98] sm:$0xff] %v883_v38 }
  0xcb   :  { %339 = vst [vmem:[#allocation7 + $0x20] sm:$0xff] %v265_v39  ;;  %v412_v58 = vmul.f32 %v265_v39, %v265_v39  ;;  %v371_v61 = vadd.f32 %v370_v57, %v265_v39  ;;  %v819_v57 = vmov 0.0  }
  0xcc   :  { %347 = vst [vmem:[#allocation7 + $0x60] sm:$0xff] %v885_v40 }
  0xcd   :  { %362 = vst [vmem:[#allocation7 + $0xd8] sm:$0xff] %v888_v41  ;;  %v443_v63 = vadd.f32 %v442_v60, %v412_v58  ;;  %v427_v58 = vmul.f32 %v883_v38, %v883_v38 }
  0xce   :  { %52 = vst [vmem:[#allocation8] sm:$0x1] %v819_v57 }
  0xcf   :  { %53 = vst [vmem:[#allocation10] sm:$0x1] %v819_v57 }
  0xd1   :  { %v892_v42 = vpop.f32.mrf.mxu2  ;;  %v897_v45 = vpop.f32.mrf.mxu3 }
  0xd2   :  { %v267_v43 = vpop.f32.mrf.mxu0  ;;  %v894_v44 = vpop.f32.mrf.mxu1  ;;  %355 = vst [vmem:[#allocation7 + $0xa0] sm:$0xff] %v892_v42 }
  0xd3   :  { %340 = vst [vmem:[#allocation7 + $0x28] sm:$0xff] %v267_v43  ;;  %v413_v62 = vmul.f32 %v267_v43, %v267_v43  ;;  %v372_v0 = vadd.f32 %v371_v61, %v267_v43  ;;  %v421_v31 = vmul.f32 %v894_v44, %v894_v44  ;;  %v428_v61 = vmul.f32 %v892_v42, %v892_v42 }
  0xd4   :  { %348 = vst [vmem:[#allocation7 + $0x68] sm:$0xff] %v894_v44 }
  0xd5   :  { %363 = vst [vmem:[#allocation7 + $0xe0] sm:$0xff] %v897_v45  ;;  %v444_v2 = vadd.f32 %v443_v63, %v413_v62 }
  0xd9   :  { %v901_v53 = vpop.f32.mrf.mxu2  ;;  %v904_v59 = vpop.f32.mrf.mxu3 }
  0xda   :  { %v270_v54 = vpop.f32.mrf.mxu0  ;;  %v290_v55 = vpop.f32.mrf.mxu1  ;;  %356 = vst [vmem:[#allocation7 + $0xa8] sm:$0xff] %v901_v53 }
  0xdb   :  { %341 = vst [vmem:[#allocation7 + $0x30] sm:$0xff] %v270_v54  ;;  %v414_v1 = vmul.f32 %v270_v54, %v270_v54  ;;  %v373_v3 = vadd.f32 %v372_v0, %v270_v54  ;;  %v422_v39 = vmul.f32 %v290_v55, %v290_v55 }
  0xdc   :  { %349 = vst [vmem:[#allocation7 + $0x70] sm:$0xff] %v290_v55 }
  0xdd   :  { %364 = vst [vmem:[#allocation7 + $0xe8] sm:$0xff] %v904_v59  ;;  %v445_v7 = vadd.f32 %v444_v2, %v414_v1 }
  0xe1   :  { %v907_v4 = vpop.f32.mrf.mxu2  ;;  %v910_v10 = vpop.f32.mrf.mxu3 }
  0xe2   :  { %v272_v5 = vpop.f32.mrf.mxu0  ;;  %v292_v6 = vpop.f32.mrf.mxu1  ;;  %357 = vst [vmem:[#allocation7 + $0xb0] sm:$0xff] %v907_v4 }
  0xe3   :  { %342 = vst [vmem:[#allocation7 + $0x38] sm:$0xff] %v272_v5  ;;  %v374_v8 = vadd.f32 %v373_v3, %v272_v5  ;;  %v415_v9 = vmul.f32 %v272_v5, %v272_v5  ;;  %v423_v48 = vmul.f32 %v292_v6, %v292_v6  ;;  %v430_v3 = vmul.f32 %v907_v4, %v907_v4 }
  0xe4   :  { %350 = vst [vmem:[#allocation7 + $0x78] sm:$0xff] %v292_v6 }
  0xe5   :  { %v375_v12 = vadd.f32 %v374_v8, %v853_v25  ;;  %v446_v13 = vadd.f32 %v445_v7, %v415_v9  ;;  %365 = vst [vmem:[#allocation7 + $0xf0] sm:$0xff] %v910_v10  ;;  %v420_v25 = vmul.f32 %v885_v40, %v885_v40  ;;  %v432_v7 = vmul.f32 %v861_v29, %v861_v29 }
  0xe6   :  { %v433_v9 = vmul.f32 %v870_v33, %v870_v33 }
  0xe7   :  { %v376_v15 = vadd.f32 %v375_v12, %v858_v28  ;;  %v447_v16 = vadd.f32 %v446_v13, %v416_v11  ;;  %v434_v12 = vmul.f32 %v879_v37, %v879_v37 }
  0xe9   :  { %v377_v18 = vadd.f32 %v376_v15, %v867_v32  ;;  %v448_v19 = vadd.f32 %v447_v16, %v417_v14  ;;  %v312_v20 = vpop.f32.mrf.mxu2  ;;  %v928_v24 = vpop.f32.mrf.mxu3  ;;  %v435_v14 = vmul.f32 %v888_v41, %v888_v41 }
  0xea   :  { %358 = vst [vmem:[#allocation7 + $0xb8] sm:$0xff] %v312_v20 }
  0xeb   :  { %v449_v22 = vadd.f32 %v448_v19, %v418_v17  ;;  %v378_v23 = vadd.f32 %v377_v18, %v876_v36  ;;  %366 = vst [vmem:[#allocation7 + $0xf8] sm:$0xff] %v928_v24  ;;  %v437_v19 = vmul.f32 %v904_v59, %v904_v59 }
  0xec   :  { %491 = dma.vmem_to_hbm [thread:$0]  %s484_s1, 4096, %s486_s29, [#allocation4], %s817_s2, %s817_s2, %s818_s30  }
  0xed   :  { %v379_v27 = vadd.f32 %v378_v23, %v885_v40  ;;  %v450_v28 = vadd.f32 %v449_v22, %v419_v21  ;;  %v438_v22 = vmul.f32 %v910_v10, %v910_v10 }
  0xef   :  { %v380_v32 = vadd.f32 %v379_v27, %v894_v44  ;;  %v451_v35 = vadd.f32 %v450_v28, %v420_v25  ;;  %v426_v44 = vmul.f32 %v874_v34, %v874_v34  ;;  %v439_v25 = vmul.f32 %v928_v24, %v928_v24 }
  0xf1   :  { %v381_v36 = vadd.f32 %v380_v32, %v290_v55  ;;  %v452_v43 = vadd.f32 %v451_v35, %v421_v31 }
  0xf3   :  { %v453_v46 = vadd.f32 %v452_v43, %v422_v39  ;;  %v382_v47 = vadd.f32 %v381_v36, %v292_v6  ;;  %v431_v6 = vmul.f32 %v312_v20, %v312_v20 }
  0xf5   :  { %v383_v40 = vadd.f32 %v382_v47, %v856_v26  ;;  %v454_v50 = vadd.f32 %v453_v46, %v423_v48  ;;  %v367_v46 = vld [vmem:[#allocation8] sm:$0x1] }
  0xf7   :  { %v384_v52 = vadd.f32 %v383_v40, %v865_v30  ;;  %v455_v54 = vadd.f32 %v454_v50, %v424_v49 }
  0xf9   :  { %v385_v55 = vadd.f32 %v384_v52, %v874_v34  ;;  %v456_v56 = vadd.f32 %v455_v54, %v425_v51  ;;  %v429_v34 = vmul.f32 %v901_v53, %v901_v53 }
  0xfb   :  { %v457_v26 = vadd.f32 %v456_v56, %v426_v44  ;;  %v386_v60 = vadd.f32 %v385_v55, %v883_v38 }
  0xfd   :  { %v387_v30 = vadd.f32 %v386_v60, %v892_v42  ;;  %v458_v62 = vadd.f32 %v457_v26, %v427_v58 }
  0xff   :  { %v388_v63 = vadd.f32 %v387_v30, %v901_v53  ;;  %v459_v0 = vadd.f32 %v458_v62, %v428_v61 }
 0x101   :  { %v460_v1 = vadd.f32 %v459_v0, %v429_v34  ;;  %v389_v2 = vadd.f32 %v388_v63, %v907_v4 }
 0x103   :  { %v461_v5 = vadd.f32 %v460_v1, %v430_v3  ;;  %v390_v38 = vadd.f32 %v389_v2, %v312_v20 }
 0x105   :  { %v391_v42 = vadd.f32 %v390_v38, %v861_v29  ;;  %v462_v8 = vadd.f32 %v461_v5, %v431_v6  ;;  %v436_v29 = vmul.f32 %v897_v45, %v897_v45 }
 0x107   :  { %v392_v53 = vadd.f32 %v391_v42, %v870_v33  ;;  %v463_v11 = vadd.f32 %v462_v8, %v432_v7 }
 0x109   :  { %v393_v4 = vadd.f32 %v392_v53, %v879_v37  ;;  %v464_v13 = vadd.f32 %v463_v11, %v433_v9 }
 0x10b   :  { %v465_v15 = vadd.f32 %v464_v13, %v434_v12  ;;  %v394_v16 = vadd.f32 %v393_v4, %v888_v41 }
 0x10d   :  { %v395_v17 = vadd.f32 %v394_v16, %v897_v45  ;;  %v466_v18 = vadd.f32 %v465_v15, %v435_v14 }
 0x10f   :  { %v396_v33 = vadd.f32 %v395_v17, %v904_v59  ;;  %v467_v20 = vadd.f32 %v466_v18, %v436_v29 }
 0x111   :  { %v468_v37 = vadd.f32 %v467_v20, %v437_v19  ;;  %v397_v21 = vadd.f32 %v396_v33, %v910_v10 }
 0x113   :  { %v469_v23 = vadd.f32 %v468_v37, %v438_v22  ;;  %v398_v41 = vadd.f32 %v397_v21, %v928_v24  ;;  %v407_v24 = vld [vmem:[#allocation10] sm:$0x1] }
 0x115   :  { %v399_v45 = vrot.slane %v398_v41, 4  ;;  %v470_v27 = vadd.f32 %v469_v23, %v439_v25 }
 0x117   :  { %v400_v28 = vadd.f32 %v399_v45, %v398_v41  ;;  %v471_v31 = vrot.slane %v470_v27, 4 }
 0x119   :  { %v401_v32 = vrot.slane %v400_v28, 2  ;;  %v472_v35 = vadd.f32 %v471_v31, %v470_v27 }
 0x11b   :  { %v402_v59 = vadd.f32 %v401_v32, %v400_v28  ;;  %v473_v36 = vrot.slane %v472_v35, 2 }
 0x11d   :  { %v403_v39 = vrot.slane %v402_v59, 1  ;;  %v474_v43 = vadd.f32 %v473_v36, %v472_v35 }
 0x11f   :  { %v404_v10 = vadd.f32 %v403_v39, %v402_v59  ;;  %v475_v47 = vrot.slane %v474_v43, 1 }
 0x121   :  { %v476_v48 = vadd.f32 %v475_v47, %v474_v43  ;;  %v405_v49 = vadd.f32 %v404_v10, %v367_v46 }
 0x123   :  { %406 = vst [vmem:[#allocation8] sm:$0x1] %v405_v49  ;;  %v477_v40 = vadd.f32 %v476_v48, %v407_v24 }
 0x124   :  { %502 = dma.vmem_to_hbm [thread:$0]  %s498_s6, 16, %s500_s9, [#allocation9]  }
 0x125   :  { %478 = vst [vmem:[#allocation10] sm:$0x1] %v477_v40 }
 0x126   :  { %513 = dma.vmem_to_hbm [thread:$0]  %s509_s11, 16, %s511_s14, [#allocation9]  }
 0x127   :  { %808 = dma.done.wait [#allocation4], 4096  }
 0x128   :  { %809 = vsyncadd [#allocation4], 4294963200 }
 0x129   :  { %810 = dma.done.wait [#allocation9], 32  }
 0x12a   :  { %811 = vsyncadd [#allocation9], 4294967264 }
 0x12b   :  { %526 = vsyncpa [#allocation3], 1 }
 0x12c   :  { %527 = vsyncpa [#allocation6], 1 }
 0x12d   :  { %528 = vsyncpa [#allocation4], 1 }
 0x12e   :  { %529 = vsyncpa [#allocation9], 1 }

</bundles_post_ra>
